<compile_context>
chip_gen: v5e
topology: v5e:2x2
jax: 0.10.0
libtpu: 0.0.40
codegen_flags: <defaults>
</compile_context>

<pallas_src>
import functools

import jax
import jax.numpy as jnp
from jax.experimental import pallas as pl
from jax.experimental.pallas import tpu as pltpu


# ---------------------------------------------------------------------------
# Fused kernel: mlp1 (Linear(3,64N)+ReLU, Linear(64N,32N)+ReLU) -> max over
# points -> mlp2 (Linear(32N,16N)+ReLU, Linear(16N,1)+Sigmoid).
# ---------------------------------------------------------------------------
def _pointnet_fused_kernel(x_ref, w1_ref, b1_ref, w2_ref, b2_ref,
                           w3_ref, b3_ref, w4_ref, b4_ref, o_ref, *, tb, p):
    # x_ref: (tb, P, 3) — tb batch elements per grid step, channels-last.
    x = x_ref[...]
    w1 = w1_ref[...]                       # (3, 64N)
    b1 = b1_ref[...]                       # (1, 64N)

    # Layer 1, K=3: three broadcast FMAs on the VPU (avoids a K=3 MXU matmul
    # whose contraction dim would be padded to the full systolic tile).
    h1 = (x[..., 0:1] * w1[0:1, :]
          + x[..., 1:2] * w1[1:2, :]
          + x[..., 2:3] * w1[2:3, :]
          + b1)                            # (tb, P, 64N)
    h1 = jnp.maximum(h1, 0.0)

    # Layer 2: real MXU matmul with M = tb*P rows.
    h1_2d = h1.reshape(tb * p, h1.shape[-1])
    h2 = jnp.dot(h1_2d, w2_ref[...],
                 preferred_element_type=jnp.float32) + b2_ref[...]
    h2 = jnp.maximum(h2, 0.0)              # (tb*P, 32N)

    # Per-batch max pool over the point axis (sublane reduction on the XLU).
    g = jnp.max(h2.reshape(tb, p, h2.shape[-1]), axis=1)     # (tb, 32N)

    # mlp2, fused in the same grid step (row-wise independent, tiny FLOPs).
    h3 = jnp.dot(g, w3_ref[...],
                 preferred_element_type=jnp.float32) + b3_ref[...]
    h3 = jnp.maximum(h3, 0.0)              # (tb, 16N)
    logit = jnp.dot(h3, w4_ref[...],
                    preferred_element_type=jnp.float32) + b4_ref[...]
    o_ref[...] = jax.nn.sigmoid(logit)     # (tb, 1)


def pointnet_forward(x, params, *, rows_per_step=512):
    """x: (B, P, 3) float32. params: weights stored as (in, out)."""
    B, P, C = x.shape
    assert C == 3, "Pointnet_3_* expects 3 input coordinates per point"
    w1, b1 = params["w1"], params["b1"]
    w2, b2 = params["w2"], params["b2"]
    w3, b3 = params["w3"], params["b3"]
    w4, b4 = params["w4"], params["b4"]

    # Batch-tile sizing: fold ~rows_per_step (batch*point) rows per grid step.
    tb = max(1, rows_per_step // P)
    if tb >= B:
        tb = B                              # single tile covers the whole batch
    else:
        tb = max(8, (tb // 8) * 8)          # keep the (tb, .) output block 8-aligned
    b_pad = -(-B // tb) * tb
    if b_pad != B:
        # Zero-pad extra batch slots; their (finite) sigmoid outputs are sliced
        # off below, so no -inf masking is needed for the per-batch max.
        x = jnp.concatenate([x, jnp.zeros((b_pad - B, P, C), x.dtype)], axis=0)

    def full(arr):
        # Whole array resident each grid step (constant block index).
        return pl.BlockSpec(arr.shape, lambda i, _nd=arr.ndim: (0,) * _nd)

    out = pl.pallas_call(
        functools.partial(_pointnet_fused_kernel, tb=tb, p=P),
        out_shape=jax.ShapeDtypeStruct((b_pad, 1), jnp.float32),
        grid_spec=pltpu.PrefetchScalarGridSpec(
            num_scalar_prefetch=0,
            grid=(b_pad // tb,),
            in_specs=[
                pl.BlockSpec((tb, P, C), lambda i: (i, 0, 0)),   # batch tile of x
                full(w1), full(b1), full(w2), full(b2),
                full(w3), full(b3), full(w4), full(b4),
            ],
            out_specs=pl.BlockSpec((tb, 1), lambda i: (i, 0)),
        ),
        compiler_params=pltpu.CompilerParams(
            dimension_semantics=("parallel",)),   # megacore-shardable on v7x
    )(x, w1, b1, w2, b2, w3, b3, w4, b4)

    return out[:B]


def init_params(key, N):
    """Deterministic init mimicking torch.nn.Linear: U(-1/sqrt(fan_in), 1/sqrt(fan_in)).
    Weights stored as (in, out) so the kernel does x @ W + b."""
    dims = [(3, 64 * N), (64 * N, 32 * N), (32 * N, 16 * N), (16 * N, 1)]
    params = {}
    keys = jax.random.split(key, 2 * len(dims))
    for i, (fan_in, fan_out) in enumerate(dims):
        bound = 1.0 / jnp.sqrt(jnp.float32(fan_in))
        w = jax.random.uniform(keys[2 * i], (fan_in, fan_out),
                               minval=-bound, maxval=bound, dtype=jnp.float32)
        b = jax.random.uniform(keys[2 * i + 1], (1, fan_out),
                               minval=-bound, maxval=bound, dtype=jnp.float32)
        params[f"w{i + 1}"] = w
        params[f"b{i + 1}"] = b
    return params


def pointnet_reference(x, params):
    """Pure-JAX reference for validation."""
    h = jnp.maximum(x @ params["w1"] + params["b1"], 0.0)
    h = jnp.maximum(h @ params["w2"] + params["b2"], 0.0)
    g = jnp.max(h, axis=1)                                    # (B, 32N)
    h = jnp.maximum(g @ params["w3"] + params["b3"], 0.0)
    return jax.nn.sigmoid(h @ params["w4"] + params["b4"])    # (B, 1)


if __name__ == "__main__":
    N = 2            # 64N=128, 32N=64, 16N=32
    B, P = 2, 16     # batch=2, 16 points, 3 coords each

    key = jax.random.PRNGKey(0)
    k_x, k_p = jax.random.split(key)
    x = jax.random.normal(k_x, (B, P, 3), dtype=jnp.float32)
    params = init_params(k_p, N)

    out = pointnet_forward(x, params)
    out = jax.block_until_ready(out)

    ref = pointnet_reference(x, params)
    assert out.shape == (B, 1), out.shape
    assert jnp.allclose(out, ref, atol=1e-5, rtol=1e-5), (out, ref)

    print("KERNEL_OK")
</pallas_src>

<mosaic_0001>
module attributes {stable_mosaic.version = 11 : i64} {
  func.func @_pointnet_fused_kernel(%arg0: i32, %arg1: memref<2x16x3xf32, #tpu.memory_space<vmem>>, %arg2: memref<3x128xf32, #tpu.memory_space<vmem>>, %arg3: memref<1x128xf32, #tpu.memory_space<vmem>>, %arg4: memref<128x64xf32, #tpu.memory_space<vmem>>, %arg5: memref<1x64xf32, #tpu.memory_space<vmem>>, %arg6: memref<64x32xf32, #tpu.memory_space<vmem>>, %arg7: memref<1x32xf32, #tpu.memory_space<vmem>>, %arg8: memref<32x1xf32, #tpu.memory_space<vmem>>, %arg9: memref<1x1xf32, #tpu.memory_space<vmem>>, %arg10: memref<2x1xf32, #tpu.memory_space<vmem>>) attributes {dimension_semantics = [#tpu.dimension_semantics<parallel>], iteration_bounds = array<i64: 1>, scalar_prefetch = 0 : i64, scratch_operands = 0 : i64, tpu.core_type = #tpu.core_type<tc>, window_params = [{transform_indices = @transform_0, window_bounds = array<i64: 2, 16, 3>}, {pipeline_mode = #tpu.pipeline_mode<synchronous>, transform_indices = @transform_1, window_bounds = array<i64: 3, 128>}, {pipeline_mode = #tpu.pipeline_mode<synchronous>, transform_indices = @transform_2, window_bounds = array<i64: 1, 128>}, {pipeline_mode = #tpu.pipeline_mode<synchronous>, transform_indices = @transform_3, window_bounds = array<i64: 128, 64>}, {pipeline_mode = #tpu.pipeline_mode<synchronous>, transform_indices = @transform_4, window_bounds = array<i64: 1, 64>}, {pipeline_mode = #tpu.pipeline_mode<synchronous>, transform_indices = @transform_5, window_bounds = array<i64: 64, 32>}, {pipeline_mode = #tpu.pipeline_mode<synchronous>, transform_indices = @transform_6, window_bounds = array<i64: 1, 32>}, {pipeline_mode = #tpu.pipeline_mode<synchronous>, transform_indices = @transform_7, window_bounds = array<i64: 32, 1>}, {pipeline_mode = #tpu.pipeline_mode<synchronous>, transform_indices = @transform_8, window_bounds = array<i64: 1, 1>}, {transform_indices = @transform_9, window_bounds = array<i64: 2, 1>}]} {
    %c0 = arith.constant 0 : index
    %c0_0 = arith.constant 0 : index
    %c0_1 = arith.constant 0 : index
    %0 = vector.load %arg1[%c0, %c0_0, %c0_1] : memref<2x16x3xf32, #tpu.memory_space<vmem>>, vector<2x16x3xf32>
    %c0_2 = arith.constant 0 : index
    %c0_3 = arith.constant 0 : index
    %1 = vector.load %arg2[%c0_2, %c0_3] : memref<3x128xf32, #tpu.memory_space<vmem>>, vector<3x128xf32>
    %c0_4 = arith.constant 0 : index
    %c0_5 = arith.constant 0 : index
    %2 = vector.load %arg3[%c0_4, %c0_5] : memref<1x128xf32, #tpu.memory_space<vmem>>, vector<1x128xf32>
    %3 = vector.extract_strided_slice %0 {offsets = [0, 0, 0], sizes = [2, 16, 1], strides = [1, 1, 1]} : vector<2x16x3xf32> to vector<2x16x1xf32>
    %4 = vector.extract_strided_slice %1 {offsets = [0, 0], sizes = [1, 128], strides = [1, 1]} : vector<3x128xf32> to vector<1x128xf32>
    %5 = vector.shape_cast %4 : vector<1x128xf32> to vector<1x1x128xf32>
    %6 = vector.broadcast %3 : vector<2x16x1xf32> to vector<2x16x128xf32>
    %7 = vector.broadcast %5 : vector<1x1x128xf32> to vector<2x16x128xf32>
    %8 = arith.mulf %6, %7 : vector<2x16x128xf32>
    %9 = vector.extract_strided_slice %0 {offsets = [0, 0, 1], sizes = [2, 16, 1], strides = [1, 1, 1]} : vector<2x16x3xf32> to vector<2x16x1xf32>
    %10 = vector.extract_strided_slice %1 {offsets = [1, 0], sizes = [1, 128], strides = [1, 1]} : vector<3x128xf32> to vector<1x128xf32>
    %11 = vector.shape_cast %10 : vector<1x128xf32> to vector<1x1x128xf32>
    %12 = vector.broadcast %9 : vector<2x16x1xf32> to vector<2x16x128xf32>
    %13 = vector.broadcast %11 : vector<1x1x128xf32> to vector<2x16x128xf32>
    %14 = arith.mulf %12, %13 : vector<2x16x128xf32>
    %15 = arith.addf %8, %14 : vector<2x16x128xf32>
    %16 = vector.extract_strided_slice %0 {offsets = [0, 0, 2], sizes = [2, 16, 1], strides = [1, 1, 1]} : vector<2x16x3xf32> to vector<2x16x1xf32>
    %17 = vector.extract_strided_slice %1 {offsets = [2, 0], sizes = [1, 128], strides = [1, 1]} : vector<3x128xf32> to vector<1x128xf32>
    %18 = vector.shape_cast %17 : vector<1x128xf32> to vector<1x1x128xf32>
    %19 = vector.broadcast %16 : vector<2x16x1xf32> to vector<2x16x128xf32>
    %20 = vector.broadcast %18 : vector<1x1x128xf32> to vector<2x16x128xf32>
    %21 = arith.mulf %19, %20 : vector<2x16x128xf32>
    %22 = arith.addf %15, %21 : vector<2x16x128xf32>
    %23 = vector.shape_cast %2 : vector<1x128xf32> to vector<1x1x128xf32>
    %24 = vector.broadcast %23 : vector<1x1x128xf32> to vector<2x16x128xf32>
    %25 = arith.addf %22, %24 : vector<2x16x128xf32>
    %cst = arith.constant 0.000000e+00 : f32
    %26 = vector.broadcast %cst : f32 to vector<2x16x128xf32>
    %27 = arith.maximumf %25, %26 : vector<2x16x128xf32>
    %28 = vector.shape_cast %27 : vector<2x16x128xf32> to vector<32x128xf32>
    %c0_6 = arith.constant 0 : index
    %c0_7 = arith.constant 0 : index
    %29 = vector.load %arg4[%c0_6, %c0_7] : memref<128x64xf32, #tpu.memory_space<vmem>>, vector<128x64xf32>
    %cst_8 = arith.constant dense<0.000000e+00> : vector<32x64xf32>
    %30 = tpu.matmul %28, %29, %cst_8 {dimension_numbers = #tpu.dot_dimension_numbers<[1], [0], [0], [1], [0, 0, 1, 1], [], []>} : vector<32x128xf32>, vector<128x64xf32>, vector<32x64xf32> -> vector<32x64xf32>
    %c0_9 = arith.constant 0 : index
    %c0_10 = arith.constant 0 : index
    %31 = vector.load %arg5[%c0_9, %c0_10] : memref<1x64xf32, #tpu.memory_space<vmem>>, vector<1x64xf32>
    %32 = vector.broadcast %31 : vector<1x64xf32> to vector<32x64xf32>
    %33 = arith.addf %30, %32 : vector<32x64xf32>
    %cst_11 = arith.constant 0.000000e+00 : f32
    %34 = vector.broadcast %cst_11 : f32 to vector<32x64xf32>
    %35 = arith.maximumf %33, %34 : vector<32x64xf32>
    %36 = vector.shape_cast %35 : vector<32x64xf32> to vector<2x16x64xf32>
    %cst_12 = arith.constant dense<0xFF800000> : vector<2x64xf32>
    %37 = vector.multi_reduction <maximumf>, %36, %cst_12 [1] : vector<2x16x64xf32> to vector<2x64xf32>
    %c0_13 = arith.constant 0 : index
    %c0_14 = arith.constant 0 : index
    %38 = vector.load %arg6[%c0_13, %c0_14] : memref<64x32xf32, #tpu.memory_space<vmem>>, vector<64x32xf32>
    %cst_15 = arith.constant dense<0.000000e+00> : vector<2x32xf32>
    %39 = tpu.matmul %37, %38, %cst_15 {dimension_numbers = #tpu.dot_dimension_numbers<[1], [0], [0], [1], [0, 0, 1, 1], [], []>} : vector<2x64xf32>, vector<64x32xf32>, vector<2x32xf32> -> vector<2x32xf32>
    %c0_16 = arith.constant 0 : index
    %c0_17 = arith.constant 0 : index
    %40 = vector.load %arg7[%c0_16, %c0_17] : memref<1x32xf32, #tpu.memory_space<vmem>>, vector<1x32xf32>
    %41 = vector.broadcast %40 : vector<1x32xf32> to vector<2x32xf32>
    %42 = arith.addf %39, %41 : vector<2x32xf32>
    %cst_18 = arith.constant 0.000000e+00 : f32
    %43 = vector.broadcast %cst_18 : f32 to vector<2x32xf32>
    %44 = arith.maximumf %42, %43 : vector<2x32xf32>
    %c0_19 = arith.constant 0 : index
    %c0_20 = arith.constant 0 : index
    %45 = vector.load %arg8[%c0_19, %c0_20] : memref<32x1xf32, #tpu.memory_space<vmem>>, vector<32x1xf32>
    %cst_21 = arith.constant dense<0.000000e+00> : vector<2x1xf32>
    %46 = tpu.matmul %44, %45, %cst_21 {dimension_numbers = #tpu.dot_dimension_numbers<[1], [0], [0], [1], [0, 0, 1, 1], [], []>} : vector<2x32xf32>, vector<32x1xf32>, vector<2x1xf32> -> vector<2x1xf32>
    %c0_22 = arith.constant 0 : index
    %c0_23 = arith.constant 0 : index
    %47 = vector.load %arg9[%c0_22, %c0_23] : memref<1x1xf32, #tpu.memory_space<vmem>>, vector<1x1xf32>
    %48 = vector.broadcast %47 : vector<1x1xf32> to vector<2x1xf32>
    %49 = arith.addf %46, %48 : vector<2x1xf32>
    %50 = arith.negf %49 : vector<2x1xf32>
    %51 = math.exp %50 : vector<2x1xf32>
    %cst_24 = arith.constant 1.000000e+00 : f32
    %52 = vector.broadcast %cst_24 : f32 to vector<2x1xf32>
    %53 = arith.addf %52, %51 : vector<2x1xf32>
    %54 = arith.divf %52, %53 : vector<2x1xf32>
    %c0_25 = arith.constant 0 : index
    %c0_26 = arith.constant 0 : index
    %55 = vector.load %arg10[%c0_25, %c0_26] : memref<2x1xf32, #tpu.memory_space<vmem>>, vector<2x1xf32>
    tpu.vector_store %arg10[%c0_25, %c0_26], %54 {strides = array<i32>} : memref<2x1xf32, #tpu.memory_space<vmem>>, vector<2x1xf32>,
    return
  }
  func.func @transform_0(%arg0: i32) -> (i32, i32, i32) {
    %c0_i32 = arith.constant 0 : i32
    %c0_i32_0 = arith.constant 0 : i32
    %c0_i32_1 = arith.constant 0 : i32
    return %arg0, %c0_i32, %c0_i32_0 : i32, i32, i32
  }
  func.func @transform_1(%arg0: i32) -> (i32, i32) {
    %c0_i32 = arith.constant 0 : i32
    %c0_i32_0 = arith.constant 0 : i32
    %c0_i32_1 = arith.constant 0 : i32
    return %c0_i32, %c0_i32_0 : i32, i32
  }
  func.func @transform_2(%arg0: i32) -> (i32, i32) {
    %c0_i32 = arith.constant 0 : i32
    %c0_i32_0 = arith.constant 0 : i32
    %c0_i32_1 = arith.constant 0 : i32
    return %c0_i32, %c0_i32_0 : i32, i32
  }
  func.func @transform_3(%arg0: i32) -> (i32, i32) {
    %c0_i32 = arith.constant 0 : i32
    %c0_i32_0 = arith.constant 0 : i32
    %c0_i32_1 = arith.constant 0 : i32
    return %c0_i32, %c0_i32_0 : i32, i32
  }
  func.func @transform_4(%arg0: i32) -> (i32, i32) {
    %c0_i32 = arith.constant 0 : i32
    %c0_i32_0 = arith.constant 0 : i32
    %c0_i32_1 = arith.constant 0 : i32
    return %c0_i32, %c0_i32_0 : i32, i32
  }
  func.func @transform_5(%arg0: i32) -> (i32, i32) {
    %c0_i32 = arith.constant 0 : i32
    %c0_i32_0 = arith.constant 0 : i32
    %c0_i32_1 = arith.constant 0 : i32
    return %c0_i32, %c0_i32_0 : i32, i32
  }
  func.func @transform_6(%arg0: i32) -> (i32, i32) {
    %c0_i32 = arith.constant 0 : i32
    %c0_i32_0 = arith.constant 0 : i32
    %c0_i32_1 = arith.constant 0 : i32
    return %c0_i32, %c0_i32_0 : i32, i32
  }
  func.func @transform_7(%arg0: i32) -> (i32, i32) {
    %c0_i32 = arith.constant 0 : i32
    %c0_i32_0 = arith.constant 0 : i32
    %c0_i32_1 = arith.constant 0 : i32
    return %c0_i32, %c0_i32_0 : i32, i32
  }
  func.func @transform_8(%arg0: i32) -> (i32, i32) {
    %c0_i32 = arith.constant 0 : i32
    %c0_i32_0 = arith.constant 0 : i32
    %c0_i32_1 = arith.constant 0 : i32
    return %c0_i32, %c0_i32_0 : i32, i32
  }
  func.func @transform_9(%arg0: i32) -> (i32, i32) {
    %c0_i32 = arith.constant 0 : i32
    %c0_i32_0 = arith.constant 0 : i32
    return %arg0, %c0_i32 : i32, i32
  }
}

</mosaic_0001>

<bundles_post_ra>
// kernel: tpu_custom_call.1
= control target key start
LH: loop header
LB: loop body
LE: loop exit
PB: predicated region body
PF: predicated region fallthrough
CT: control target
= control target key end

     0   :  { %v333_v0 = vmov 2   ;;  %v334_v1 = vmov 0   ;;  %v335_v4 = vmov 1   ;;  %vm179_vm0 = vcmask 523264   ;;  %s505_s0 = inlined_call_operand.vmem [shape: f32[2,16,3], index: 0, kind: input, shape index: {}]   ;;  %s506_s3 = inlined_call_operand.vmem [shape: f32[128,64], index: 3, kind: input, shape index: {}]   ;;  %s507_s2 = inlined_call_operand.vmem [shape: f32[1,128], index: 2, kind: input, shape index: {}]   ;;  %s508_s4 = inlined_call_operand.vmem [shape: f32[1,64], index: 4, kind: input, shape index: {}]   ;;  %s509_s1 = inlined_call_operand.vmem [shape: f32[3,128], index: 1, kind: input, shape index: {}]   ;;  %s510_s6 = inlined_call_operand.vmem [shape: f32[1,32], index: 6, kind: input, shape index: {}]   ;;  %s511_s5 = inlined_call_operand.vmem [shape: f32[64,32], index: 5, kind: input, shape index: {}]   ;;  %s512_s7 = inlined_call_operand.vmem [shape: f32[32,1], index: 7, kind: input, shape index: {}]   ;;  %s513_s8 = inlined_call_operand.<no memory space> [shape: f32[1,1], index: 8, kind: input, shape index: {}]   ;;  %s514_s9 = inlined_call_operand.vmem [shape: f32[2,1], index: 9, kind: output, shape index: {}]  }
   0x1   :  { %318 = vset.pattern.permute.xlu1 %v333_v0  ;;  %316 = vset.pattern.permute.xlu0 %v334_v1  ;;  %v35_v2 = vld [vmem:[%s505_s0 + $0x8] sm:$0xff]  ;;  %v36_v3 = vld [vmem:[%s505_s0 + $0x10] sm:$0xff]  ;;  %v141_v5 = vld [vmem:[%s506_s3 + $0x78] sm:$0xff]  ;;  %vm212_vm1 = vcmask 1041409   ;;  %vm245_vm2 = vcmask 261120   ;;  %vm288_vm6 = vcmask 1024  }
   0x2   :  { %95 = vperm.xlu1 %318, %v35_v2   ;;  %47 = vperm.xlu0 %316, %v35_v2   ;;  %v140_v6 = vld [vmem:[%s506_s3 + $0x70] sm:$0xff]  ;;  %v139_v7 = vld [vmem:[%s506_s3 + $0x68] sm:$0xff]  ;;  %v138_v8 = vld [vmem:[%s506_s3 + $0x60] sm:$0xff] }
   0x3   :  { %320 = vset.pattern.permute.xlu2 %v335_v4  ;;  %297 = vmatpush.msra.mxu3 %v141_v5  ;;  %v137_v9 = vld [vmem:[%s506_s3 + $0x58] sm:$0xff]  ;;  %v136_v10 = vld [vmem:[%s506_s3 + $0x50] sm:$0xff]  ;;  %v34_v12 = vld [vmem:[%s505_s0] sm:$0xff] }
   0x4   :  { %74 = vperm.xlu2 %320, %v36_v3   ;;  %146 = vmatpush.msra.mxu0 %v141_v5  ;;  %v37_v11 = vld [vmem:[%s505_s0 + $0x18] sm:$0xff]  ;;  %v135_v13 = vld [vmem:[%s506_s3 + $0x48] sm:$0xff]  ;;  %v134_v14 = vld [vmem:[%s506_s3 + $0x40] sm:$0xff] }
   0x5   :  { %298 = vmatpush.msra.mxu3 %v140_v6  ;;  %v133_v15 = vld [vmem:[%s506_s3 + $0x38] sm:$0xff]  ;;  %v132_v16 = vld [vmem:[%s506_s3 + $0x30] sm:$0xff]  ;;  %v131_v17 = vld [vmem:[%s506_s3 + $0x28] sm:$0xff] }
   0x6   :  { %147 = vmatpush.msra.mxu0 %v140_v6  ;;  %v130_v18 = vld [vmem:[%s506_s3 + $0x20] sm:$0xff]  ;;  %v129_v19 = vld [vmem:[%s506_s3 + $0x18] sm:$0xff]  ;;  %v128_v20 = vld [vmem:[%s506_s3 + $0x10] sm:$0xff] }
   0x7   :  { %299 = vmatpush.msra.mxu3 %v139_v7  ;;  %v127_v21 = vld [vmem:[%s506_s3 + $0x8] sm:$0xff]  ;;  %v126_v22 = vld [vmem:[%s506_s3] sm:$0xff]  ;;  %v204_v5 = vld [vmem:[%s511_s5 + $0x30] sm:$0xff] }
   0x8   :  { %148 = vmatpush.msra.mxu0 %v139_v7  ;;  %v38_v26 = vld [vmem:[%s509_s1] sm:$0x7]  ;;  %v203_v6 = vld [vmem:[%s511_s5 + $0x28] sm:$0xff] }
   0x9   :  { %300 = vmatpush.msra.mxu3 %v138_v8  ;;  %v60_v28 = vperm.slane %v38_v26, 0  ;;  %v81_v29 = vperm.slane %v38_v26, 1  ;;  %v106_v30 = vperm.slane %v38_v26, 2  ;;  %v325_v39 = vld [vmem:[%s507_s2] ss:$0 sm:$0xff] }
   0xa   :  { %319 = vset.pattern.permute.xlu1 %v334_v1  ;;  %317 = vset.pattern.permute.xlu0 %v335_v4  ;;  %v202_v7 = vld [vmem:[%s511_s5 + $0x20] sm:$0xff] }
   0xb   :  { %52 = vperm.xlu1 %319, %v36_v3   ;;  %70 = vperm.xlu0 %317, %v35_v2  }
   0xc   :  { %321 = vset.pattern.permute.xlu2 %v333_v0  ;;  %149 = vmatpush.msra.mxu0 %v138_v8  ;;  %v201_v8 = vld [vmem:[%s511_s5 + $0x18] sm:$0xff] }
   0xd   :  { %99 = vperm.xlu2 %321, %v36_v3   ;;  %301 = vmatpush.msra.mxu3 %v137_v9 }
   0xe   :  { %150 = vmatpush.msra.mxu0 %v137_v9  ;;  %v200_v9 = vld [vmem:[%s511_s5 + $0x10] sm:$0xff] }
   0xf   :  { %302 = vmatpush.msra.mxu3 %v136_v10 }
  0x10   :  { %151 = vmatpush.msra.mxu0 %v136_v10 }
  0x11   :  { %303 = vmatpush.msra.mxu3 %v135_v13 }
  0x12   :  { %152 = vmatpush.msra.mxu0 %v135_v13  ;;  %v240_v13 = vld [vmem:[%s512_s7 + $0x18] sm:$0xff] }
  0x13   :  { %57 = vperm.xlu1 %319, %v37_v11   ;;  %323 = vset.pattern.permute.xlu0 %v333_v0 }
  0x14   :  { %103 = vperm.xlu0 %323, %v37_v11   ;;  %304 = vmatpush.msra.mxu3 %v134_v14 }
  0x15   :  { %322 = vset.pattern.permute.xlu2 %v335_v4  ;;  %153 = vmatpush.msra.mxu0 %v134_v14  ;;  %v205_v4 = vld [vmem:[%s511_s5 + $0x38] sm:$0xff] }
  0x16   :  { %78 = vperm.xlu2 %322, %v37_v11   ;;  %305 = vmatpush.msra.mxu3 %v133_v15  ;;  %v199_v11 = vld [vmem:[%s511_s5 + $0x8] sm:$0xff] }
  0x17   :  { %154 = vmatpush.msra.mxu0 %v133_v15  ;;  %224 = vmatpush.msra.mxu1 %v205_v4  ;;  %v326_v15 = vld [vmem:[%s508_s4] ss:$0 sm:$0xff] }
  0x18   :  { %306 = vmatpush.msra.mxu3 %v132_v16  ;;  %261 = vmatpush.msra.mxu2 %v240_v13 }
  0x19   :  { %155 = vmatpush.msra.mxu0 %v132_v16  ;;  %225 = vmatpush.msra.mxu1 %v204_v5 }
  0x1a   :  { %307 = vmatpush.msra.mxu3 %v131_v17 }
  0x1b   :  { %42 = vperm.xlu1 %319, %v34_v12   ;;  %156 = vmatpush.msra.mxu0 %v131_v17 }
  0x1c   :  { %308 = vmatpush.msra.mxu3 %v130_v18  ;;  %226 = vmatpush.msra.mxu1 %v203_v6 }
  0x1d   :  { %157 = vmatpush.msra.mxu0 %v130_v18 }
  0x1e   :  { %66 = vperm.xlu2 %322, %v34_v12   ;;  %309 = vmatpush.msra.mxu3 %v129_v19 }
  0x1f   :  { %158 = vmatpush.msra.mxu0 %v129_v19  ;;  %227 = vmatpush.msra.mxu1 %v202_v7 }
  0x20   :  { %310 = vmatpush.msra.mxu3 %v128_v20 }
  0x21   :  { %159 = vmatpush.msra.mxu0 %v128_v20  ;;  %228 = vmatpush.msra.mxu1 %v201_v8 }
  0x22   :  { %311 = vmatpush.msra.mxu3 %v127_v21 }
  0x23   :  { %324 = vset.pattern.permute.xlu1 %v333_v0  ;;  %160 = vmatpush.msra.mxu0 %v127_v21 }
  0x24   :  { %91 = vperm.xlu1 %324, %v34_v12   ;;  %312 = vmatpush.msra.mxu3 %v126_v22  ;;  %v198_v12 = vld [vmem:[%s511_s5] sm:$0xff] }
  0x25   :  { %161 = vmatpush.msra.mxu0 %v126_v22  ;;  %229 = vmatpush.msra.mxu1 %v200_v9 }
  0x27   :  { %230 = vmatpush.msra.mxu1 %v199_v11 }
  0x29   :  { %231 = vmatpush.msra.mxu1 %v198_v12 }
  0x5e   :  { %v75_v23 = vpop.permute.xlu2 %74 }
  0x5f   :  { %v84_v36 = vmul.f32 %v81_v29, %v75_v23 }
  0x67   :  { %v100_v27 = vpop.permute.xlu2 %99 }
  0x68   :  { %v109_v40 = vmul.f32 %v106_v30, %v100_v27 }
  0x70   :  { %v79_v43 = vpop.permute.xlu2 %78 }
  0x71   :  { %v85_v46 = vmul.f32 %v81_v29, %v79_v43 }
  0x74   :  { %v96_v24 = vpop.permute.xlu1 %95  ;;  %v48_v25 = vpop.permute.xlu0 %47 }
  0x75   :  { %v62_v33 = vmul.f32 %v60_v28, %v48_v25  ;;  %v108_v37 = vmul.f32 %v106_v30, %v96_v24 }
  0x78   :  { %v67_v57 = vpop.permute.xlu2 %66 }
  0x79   :  { %v82_v59 = vmul.f32 %v81_v29, %v67_v57 }
  0x7d   :  { %v53_v31 = vpop.permute.xlu1 %52  ;;  %v71_v32 = vpop.permute.xlu0 %70 }
  0x7e   :  { %v63_v34 = vmul.f32 %v60_v28, %v53_v31  ;;  %v83_v35 = vmul.f32 %v81_v29, %v71_v32 }
  0x80   :  { %v87_v38 = vadd.f32 %v83_v35, %v62_v33  ;;  %v88_v41 = vadd.f32 %v84_v36, %v63_v34 }
  0x82   :  { %v112_v42 = vadd.f32 %v108_v37, %v87_v38  ;;  %v113_v49 = vadd.f32 %v109_v40, %v88_v41 }
  0x84   :  { %v119_v44 = vadd.f32 %v325_v39, %v112_v42  ;;  %v120_v53 = vadd.f32 %v325_v39, %v113_v49  ;;  %v327_v49 = vld [vmem:[%s510_s6] ss:$0 sm:$0xff] }
  0x85   :  { %v58_v45 = vpop.permute.xlu1 %57 }
  0x86   :  { %v64_v47 = vmul.f32 %v60_v28, %v58_v45  ;;  %v123_v48 = vmax.f32 %v119_v44, 0.0  ;;  %v104_v50 = vpop.permute.xlu0 %103  ;;  %v124_v56 = vmax.f32 %v120_v53, 0.0  ;;  %v239_v45 = vld [vmem:[%s512_s7 + $0x10] sm:$0xff] }
  0x87   :  { %v110_v52 = vmul.f32 %v106_v30, %v104_v50  ;;  %262 = vmatpush.msra.mxu2 %v239_v45 }
  0x88   :  { %165 = vmatmul.f32.vlgmr.msra.gmra.mxu3 %v123_v48  ;;  %v89_v51 = vadd.f32 %v85_v46, %v64_v47  ;;  %v238_v46 = vld [vmem:[%s512_s7 + $0x8] sm:$0xff]  ;;  %v237_v47 = vld [vmem:[%s512_s7] sm:$0xff]  ;;  %v14_v48 = vstv %s513_s8 }
  0x89   :  { %263 = vmatpush.msra.mxu2 %v238_v46  ;;  %15 = vst [vmem:[#allocation2] sm:$0x1] %v14_v48 }
  0x8a   :  { %v114_v55 = vadd.f32 %v110_v52, %v89_v51 }
  0x8b   :  { %264 = vmatpush.msra.mxu2 %v237_v47 }
  0x8c   :  { %v121_v58 = vadd.f32 %v325_v39, %v114_v55 }
  0x8d   :  { %v43_v54 = vpop.permute.xlu1 %42 }
  0x8e   :  { %v61_v60 = vmul.f32 %v60_v28, %v43_v54  ;;  %v125_v62 = vmax.f32 %v121_v58, 0.0 }
  0x90   :  { %168 = vmatmul.f32.gmra.mxu3 %v124_v56  ;;  %v86_v63 = vadd.f32 %v82_v59, %v61_v60  ;;  %v328_v53 = vld [vmem:[#allocation2] ss:$0 sm:$0xff] }
  0x96   :  { %v92_v61 = vpop.permute.xlu1 %91 }
  0x97   :  { %v107_v0 = vmul.f32 %v106_v30, %v92_v61 }
  0x98   :  { %171 = vmatmul.f32.gmra.mxu3 %v125_v62 }
  0x99   :  { %v111_v1 = vadd.f32 %v107_v0, %v86_v63 }
  0x9b   :  { %v118_v2 = vadd.f32 %v325_v39, %v111_v1 }
  0x9d   :  { %v122_v3 = vmax.f32 %v118_v2, 0.0 }
  0x9f   :  { %162 = vmatmul.f32.vlgmr.msra.gmra.mxu0 %v122_v3 }
 0x10b   :  { %v166_v10 = vpop.f32.mrf.mxu3 }
 0x10c   :  { %v167_v17 = vadd.f32 %v326_v15, %v166_v10 }
 0x10e   :  { %v176_v22 = vmax.f32 %v167_v17, 0.0 }
 0x110   :  { %v181_v28 = vsel %vm179_vm0, %v176_v22, -inf }
 0x113   :  { %v169_v14 = vpop.f32.mrf.mxu3 }
 0x114   :  { %v170_v16 = vadd.f32 %v326_v15, %v169_v14 }
 0x116   :  { %v177_v19 = vmax.f32 %v170_v16, 0.0 }
 0x118   :  { %v189_v26 = vsel %vm179_vm0, %v177_v19, -inf }
 0x11b   :  { %v172_v18 = vpop.f32.mrf.mxu3 }
 0x11c   :  { %v173_v20 = vadd.f32 %v326_v15, %v172_v18  ;;  %v163_v21 = vpop.f32.mrf.mxu0 }
 0x11d   :  { %v164_v23 = vadd.f32 %v326_v15, %v163_v21 }
 0x11e   :  { %v178_v24 = vmax.f32 %v173_v20, 0.0 }
 0x11f   :  { %v175_v25 = vmax.f32 %v164_v23, 0.0 }
 0x120   :  { %v190_v27 = vsel %vm179_vm0, %v178_v24, -inf }
 0x121   :  { %v191_v29 = vmax.f32 %v189_v26, %v190_v27  ;;  %v180_v30 = vsel %vm179_vm0, %v175_v25, -inf }
 0x122   :  { %v182_v31 = vmax.f32 %v180_v30, %v181_v28 }
 0x123   :  { %v192_v32 = vrot.slane %v191_v29, 4 }
 0x124   :  { %v183_v33 = vrot.slane %v182_v31, 4 }
 0x125   :  { %v193_v34 = vmax.f32 %v191_v29, %v192_v32 }
 0x126   :  { %v184_v35 = vmax.f32 %v182_v31, %v183_v33 }
 0x127   :  { %v194_v36 = vrot.slane %v193_v34, 2 }
 0x128   :  { %v185_v37 = vrot.slane %v184_v35, 2 }
 0x129   :  { %v195_v38 = vmax.f32 %v193_v34, %v194_v36 }
 0x12a   :  { %v186_v39 = vmax.f32 %v184_v35, %v185_v37 }
 0x12b   :  { %v196_v40 = vrot.slane %v195_v38, 1 }
 0x12c   :  { %v187_v41 = vrot.slane %v186_v39, 1 }
 0x12d   :  { %v197_v42 = vmax.f32 %v195_v38, %v196_v40 }
 0x12e   :  { %v188_v43 = vmax.f32 %v186_v39, %v187_v41 }
 0x130   :  { %v213_v44 = vsel %vm212_vm1, %v197_v42, %v188_v43 }
 0x131   :  { %294 = vmatmul.msk.f32.vlgmr.msra.gmra.mxu1 %vm179_vm0, %v213_v44 }
 0x1ae   :  { %v233_v50 = vpop.f32.mrf.mxu1 }
 0x1af   :  { %v234_v51 = vadd.f32 %v327_v49, %v233_v50 }
 0x1b1   :  { %v236_v52 = vmax.f32 %v234_v51, 0.0 }
 0x1b3   :  { %295 = vmatmul.msk.f32.vlgmr.msra.gmra.mxu2 %vm245_vm2, %v236_v52 }
 0x236   :  { %v266_v54 = vpop.f32.mrf.mxu2 }
 0x237   :  { %v267_v55 = vadd.f32 %v328_v53, %v266_v54 }
 0x239   :  { %v296_v56 = vmul.f32 -1.442695, %v267_v55 }
 0x23b   :  { %329 = vpow2.f32 %v296_v56 }
 0x241   :  { %v330_v57 = vpop.eup %329 }
 0x242   :  { %v272_v58 = vadd.f32 1.0, %v330_v57 }
 0x244   :  { %331 = vrcp.f32 %v272_v58  ;;  %v284_v62 = vand.u32 2147483648, %v272_v58  ;;  %v282_v0 = vand.u32 2147483647, %v272_v58  ;;  %vm278_vm4 = vweird.f32 %v272_v58 }
 0x246   :  { %v285_v2 = vor.u32 1.1754944e-38, %v284_v62  ;;  %vm283_vm7 = vcmp.eq.f32.partialorder %v282_v0, 8.507059e+37 }
 0x24a   :  { %v332_v59 = vpop.eup %331 }
 0x24b   :  { %v274_v60 = vmul.f32 %v332_v59, %v272_v58  ;;  %vm279_vm3 = vweird.f32 %v332_v59 }
 0x24c   :  { %vm280_vm5 = vmor %vm278_vm4, %vm279_vm3 }
 0x24d   :  { %v275_v61 = vsub.f32 1.0, %v274_v60 }
 0x24f   :  { %v276_v63 = vmul.f32 %v332_v59, %v275_v61 }
 0x251   :  { %v277_v1 = vadd.f32 %v332_v59, %v276_v63 }
 0x253   :  { %v281_v3 = vsel %vm280_vm5, %v332_v59, %v277_v1 }
 0x254   :  { %v286_v4 = vsel %vm283_vm7, %v285_v2, %v281_v3 }
 0x255   :  { %289 = vst.msk [vmem:[%s514_s9] sm:$0x3] %vm288_vm6, %v286_v4 }

</bundles_post_ra>
